<compile_context>
chip_gen: v7x
topology: tpu7x:2x2x1
jax: 0.10.0
libtpu: 0.0.40
codegen_flags: <defaults>
</compile_context>

<pallas_src>
import jax
import jax.numpy as jnp
from jax.experimental import pallas as pl
from jax.experimental.pallas import tpu as pltpu

NODE_STEPS = 2
NODE_MULTIPLIER = 2
NUM_INPUT_NODES = 2
NUM_EDGES = sum(NUM_INPUT_NODES + i for i in range(NODE_STEPS))  # 5
NUM_EDGE_PRIMITIVES = 2   # ['none', 'skip']
NUM_NODE_PRIMITIVES = 2   # ['Sum', 'ConcatFC']
LN_EPS = 1e-5
BN_EPS = 1e-5


def _node_cell_kernel(ew_ref, nw_ref,                 # SMEM: (E,), (S,)
                      x_ref, y_ref,                   # VMEM: (TB, C, L)
                      cfc_w_ref, cfc_b_ref,           # VMEM: (S, C, C), (S, C, 1)
                      ow_ref, ob_ref,                 # VMEM: (C, M*C), (C, 1)
                      ln_w_ref, ln_b_ref,             # VMEM: (C, L)
                      o_ref):                         # VMEM: (TB, C, L)
    TB = x_ref.shape[0]
    C, L = ln_w_ref.shape

    ln_w = ln_w_ref[...]
    ln_b = ln_b_ref[...]
    ow = ow_ref[...]
    ob = ob_ref[...]
    inv_cl = 1.0 / float(C * L)

    # Static per-sample loop (TB is a compile-time constant and small).
    # TODO(synk): switch to lax.fori_loop with dynamic x_ref[t] indexing if
    # TB per chunk grows large enough for code size to matter.
    for t in range(TB):
        x = x_ref[t]                                   # (C, L)
        y = y_ref[t]
        states = [x, y]
        offset = 0
        for i in range(NODE_STEPS):
            # FusionMixedOp over ['none', 'skip']: w[0]*0 + w[1]*h
            step_in = ew_ref[offset] * states[0]
            for j in range(1, len(states)):
                step_in = step_in + ew_ref[offset + j] * states[j]

            # NodeMixedOp over ['Sum', 'ConcatFC'] on (step_in, step_in).
            # 'Sum' doubling is folded into nw_ref[i]; ConcatFC's duplicated
            # input concat AND nw[i,1] are folded into cfc_w_ref / cfc_b_ref.
            cfc = jnp.dot(cfc_w_ref[i], step_in,
                          preferred_element_type=jnp.float32) + cfc_b_ref[i]
            cfc = jnp.maximum(cfc, 0.0)
            s = nw_ref[i] * step_in + cfc

            offset += len(states)
            states.append(s)

        # out_conv (1x1 Conv1d) over cat(last M states): one fused
        # (C, M*C) x (M*C, L) matmul (sublane concat), BatchNorm folded in.
        cat = jnp.concatenate(states[-NODE_MULTIPLIER:], axis=0)   # (M*C, L)
        out = jnp.dot(ow, cat, preferred_element_type=jnp.float32) + ob
        out = jnp.maximum(out, 0.0)

        # dropout: identity in eval mode; residual add
        out = out + x

        # LayerNorm([C, L]) per sample: sublane reduce first, then one lane
        # reduce per stat; single-pass variance clamped at zero.
        col1 = jnp.sum(out, axis=0, keepdims=True)                 # (1, L)
        col2 = jnp.sum(out * out, axis=0, keepdims=True)           # (1, L)
        mean = jnp.sum(col1) * inv_cl
        var = jnp.maximum(jnp.sum(col2) * inv_cl - mean * mean, 0.0)
        o_ref[t] = ((out - mean) * jax.lax.rsqrt(var + LN_EPS)) * ln_w + ln_b


def fold_params(ew, nw, cfc_w, cfc_b, ow, ob, bn_scale, bn_shift):
    """Host-side algebraic folds. Call ONCE per weight update, not per step.

    Folds performed:
      * ConcatFC of a duplicated input: W @ cat(h, h) == (W[:,:C]+W[:,C:]) @ h
      * node softmax weight nw[:,1] into the ConcatFC weight/bias
        (valid since softmax => nw >= 0 => a*relu(z) == relu(a*z))
      * node 'Sum' op (h + h) into the node weight: 2*nw[:,0]
      * eval-mode BatchNorm1d scale/shift into the out_conv weight/bias
    """
    C = cfc_w.shape[1]
    g1 = nw[:, 1][:, None, None]
    cfc_w_eff = (cfc_w[:, :, :C] + cfc_w[:, :, C:]) * g1           # (S, C, C)
    cfc_b_eff = cfc_b * g1                                         # (S, C, 1)
    nw_sum = 2.0 * nw[:, 0]                                        # (S,)
    ow_eff = bn_scale * ow                                         # (C, M*C)
    ob_eff = bn_scale * ob + bn_shift                              # (C, 1)
    ew_skip = ew[:, 1]                                             # (E,)
    return ew_skip, nw_sum, cfc_w_eff, cfc_b_eff, ow_eff, ob_eff


def node_cell_forward(x, y, folded, ln_w, ln_b, *, num_chunks=1):
    """x, y: (B, C, L).  folded: output of fold_params().  Returns (B, C, L).

    num_chunks: number of grid steps (batch chunks).  Default 1 = whole batch
    in one program (best on single-TC v5e/v6e).
    TODO(synk): on v7x set num_chunks to a multiple of 2 so both TensorCores
    get 'parallel' grid work, and budget per-chunk VMEM against the 64 MiB
    part (roughly half what v5e/v6e tolerate) for large B*L.
    """
    ew_skip, nw_sum, cfc_w_eff, cfc_b_eff, ow_eff, ob_eff = folded
    B, C, L = x.shape
    S = NODE_STEPS
    M = NODE_MULTIPLIER
    assert B % num_chunks == 0
    TB = B // num_chunks

    return pl.pallas_call(
        _node_cell_kernel,
        out_shape=jax.ShapeDtypeStruct((B, C, L), jnp.float32),
        grid=(num_chunks,),
        in_specs=[
            pl.BlockSpec(memory_space=pltpu.MemorySpace.SMEM),     # edge w (skip)
            pl.BlockSpec(memory_space=pltpu.MemorySpace.SMEM),     # node w (2*Sum)
            pl.BlockSpec((TB, C, L), lambda b: (b, 0, 0)),         # x chunk
            pl.BlockSpec((TB, C, L), lambda b: (b, 0, 0)),         # y chunk
            pl.BlockSpec((S, C, C), lambda b: (0, 0, 0)),          # ConcatFC W
            pl.BlockSpec((S, C, 1), lambda b: (0, 0, 0)),          # ConcatFC b
            pl.BlockSpec((C, M * C), lambda b: (0, 0)),            # out_conv W
            pl.BlockSpec((C, 1), lambda b: (0, 0)),                # out_conv b
            pl.BlockSpec((C, L), lambda b: (0, 0)),                # ln weight
            pl.BlockSpec((C, L), lambda b: (0, 0)),                # ln bias
        ],
        out_specs=pl.BlockSpec((TB, C, L), lambda b: (b, 0, 0)),
        compiler_params=pltpu.CompilerParams(
            dimension_semantics=("parallel",)),
    )(ew_skip, nw_sum, x, y, cfc_w_eff, cfc_b_eff, ow_eff, ob_eff, ln_w, ln_b)


def node_cell_ref(x, y, ew, nw, cfc_w, cfc_b, ow, ob,
                  bn_scale, bn_shift, ln_w, ln_b):
    """Pure-JAX reference of the same math (for correctness check)."""
    states = [x, y]
    offset = 0
    for i in range(NODE_STEPS):
        step_in = sum(ew[offset + j, 1] * h for j, h in enumerate(states))
        sum_out = step_in + step_in
        cat_ab = jnp.concatenate([step_in, step_in], axis=1)
        cfc = jnp.einsum('ck,bkl->bcl', cfc_w[i], cat_ab) + cfc_b[i][None]
        cfc = jnp.maximum(cfc, 0.0)
        s = nw[i, 0] * sum_out + nw[i, 1] * cfc
        offset += len(states)
        states.append(s)
    out = jnp.concatenate(states[-NODE_MULTIPLIER:], axis=1)
    out = jnp.einsum('ck,bkl->bcl', ow, out) + ob[None]
    out = out * bn_scale[None] + bn_shift[None]
    out = jnp.maximum(out, 0.0)
    out = out + x
    mean = out.mean(axis=(1, 2), keepdims=True)
    var = ((out - mean) ** 2).mean(axis=(1, 2), keepdims=True)
    out = (out - mean) * jax.lax.rsqrt(var + LN_EPS)
    return out * ln_w[None] + ln_b[None]


if __name__ == "__main__":
    B, C, L = 2, 8, 128   # args.C = 8, args.L = 128

    keys = jax.random.split(jax.random.PRNGKey(0), 16)
    x = jax.random.normal(keys[0], (B, C, L), jnp.float32)
    y = jax.random.normal(keys[1], (B, C, L), jnp.float32)

    # DARTS architecture weights (softmaxed alphas / betas / gammas)
    ew = jax.nn.softmax(
        jax.random.normal(keys[2], (NUM_EDGES, NUM_EDGE_PRIMITIVES)), axis=-1)
    nw = jax.nn.softmax(
        jax.random.normal(keys[3], (NODE_STEPS, NUM_NODE_PRIMITIVES)), axis=-1)

    # NodeMixedOp ConcatFC 1x1 convs (one per node step)
    cfc_w = 0.1 * jax.random.normal(keys[4], (NODE_STEPS, C, 2 * C), jnp.float32)
    cfc_b = 0.1 * jax.random.normal(keys[5], (NODE_STEPS, C, 1), jnp.float32)

    # out_conv: Conv1d(C*node_multiplier, C, 1, 1)
    ow = 0.1 * jax.random.normal(keys[6], (C, NODE_MULTIPLIER * C), jnp.float32)
    ob = 0.1 * jax.random.normal(keys[7], (C, 1), jnp.float32)

    # BatchNorm1d(C) in eval mode -> per-channel affine scale/shift
    bn_gamma = 1.0 + 0.1 * jax.random.normal(keys[8], (C, 1), jnp.float32)
    bn_beta = 0.1 * jax.random.normal(keys[9], (C, 1), jnp.float32)
    bn_mean = 0.05 * jax.random.normal(keys[10], (C, 1), jnp.float32)
    bn_var = 1.0 + 0.1 * jnp.abs(jax.random.normal(keys[11], (C, 1), jnp.float32))
    bn_scale = bn_gamma / jnp.sqrt(bn_var + BN_EPS)
    bn_shift = bn_beta - bn_mean * bn_scale

    # LayerNorm([C, L]) elementwise affine
    ln_w = 1.0 + 0.1 * jax.random.normal(keys[12], (C, L), jnp.float32)
    ln_b = 0.1 * jax.random.normal(keys[13], (C, L), jnp.float32)

    # Host-side folds done once (outside the per-call forward path).
    folded = fold_params(ew, nw, cfc_w, cfc_b, ow, ob, bn_scale, bn_shift)
    folded = jax.block_until_ready(folded)

    out = node_cell_forward(x, y, folded, ln_w, ln_b, num_chunks=1)
    out = jax.block_until_ready(out)

    ref = node_cell_ref(x, y, ew, nw, cfc_w, cfc_b, ow, ob,
                        bn_scale, bn_shift, ln_w, ln_b)
    assert out.shape == (B, C, L)
    assert bool(jnp.allclose(out, ref, rtol=2e-2, atol=2e-2)), "mismatch vs reference"

    print("KERNEL_OK")
</pallas_src>

<mosaic_0001>
module attributes {stable_mosaic.version = 11 : i64} {
  func.func @_node_cell_kernel(%arg0: i32, %arg1: memref<5xf32, #tpu.memory_space<smem>>, %arg2: memref<2xf32, #tpu.memory_space<smem>>, %arg3: memref<2x8x128xf32, #tpu.memory_space<vmem>>, %arg4: memref<2x8x128xf32, #tpu.memory_space<vmem>>, %arg5: memref<2x8x8xf32, #tpu.memory_space<vmem>>, %arg6: memref<2x8x1xf32, #tpu.memory_space<vmem>>, %arg7: memref<8x16xf32, #tpu.memory_space<vmem>>, %arg8: memref<8x1xf32, #tpu.memory_space<vmem>>, %arg9: memref<8x128xf32, #tpu.memory_space<vmem>>, %arg10: memref<8x128xf32, #tpu.memory_space<vmem>>, %arg11: memref<2x8x128xf32, #tpu.memory_space<vmem>>) attributes {dimension_semantics = [#tpu.dimension_semantics<parallel>], iteration_bounds = array<i64: 1>, scalar_prefetch = 0 : i64, scratch_operands = 0 : i64, tpu.core_type = #tpu.core_type<tc>, window_params = [{transform_indices = @transform_0, window_bounds = array<i64: 5>}, {transform_indices = @transform_1, window_bounds = array<i64: 2>}, {transform_indices = @transform_2, window_bounds = array<i64: 2, 8, 128>}, {transform_indices = @transform_3, window_bounds = array<i64: 2, 8, 128>}, {pipeline_mode = #tpu.pipeline_mode<synchronous>, transform_indices = @transform_4, window_bounds = array<i64: 2, 8, 8>}, {pipeline_mode = #tpu.pipeline_mode<synchronous>, transform_indices = @transform_5, window_bounds = array<i64: 2, 8, 1>}, {pipeline_mode = #tpu.pipeline_mode<synchronous>, transform_indices = @transform_6, window_bounds = array<i64: 8, 16>}, {pipeline_mode = #tpu.pipeline_mode<synchronous>, transform_indices = @transform_7, window_bounds = array<i64: 8, 1>}, {pipeline_mode = #tpu.pipeline_mode<synchronous>, transform_indices = @transform_8, window_bounds = array<i64: 8, 128>}, {pipeline_mode = #tpu.pipeline_mode<synchronous>, transform_indices = @transform_9, window_bounds = array<i64: 8, 128>}, {transform_indices = @transform_10, window_bounds = array<i64: 2, 8, 128>}]} {
    %c0 = arith.constant 0 : index
    %c0_0 = arith.constant 0 : index
    %0 = vector.load %arg9[%c0, %c0_0] : memref<8x128xf32, #tpu.memory_space<vmem>>, vector<8x128xf32>
    %c0_1 = arith.constant 0 : index
    %c0_2 = arith.constant 0 : index
    %1 = vector.load %arg10[%c0_1, %c0_2] : memref<8x128xf32, #tpu.memory_space<vmem>>, vector<8x128xf32>
    %c0_3 = arith.constant 0 : index
    %c0_4 = arith.constant 0 : index
    %2 = vector.load %arg7[%c0_3, %c0_4] : memref<8x16xf32, #tpu.memory_space<vmem>>, vector<8x16xf32>
    %c0_5 = arith.constant 0 : index
    %c0_6 = arith.constant 0 : index
    %3 = vector.load %arg8[%c0_5, %c0_6] : memref<8x1xf32, #tpu.memory_space<vmem>>, vector<8x1xf32>
    %c0_7 = arith.constant 0 : index
    %c0_8 = arith.constant 0 : index
    %c0_9 = arith.constant 0 : index
    %4 = vector.load %arg3[%c0_7, %c0_8, %c0_9] : memref<2x8x128xf32, #tpu.memory_space<vmem>>, vector<1x8x128xf32>
    %5 = vector.shape_cast %4 : vector<1x8x128xf32> to vector<8x128xf32>
    %c0_10 = arith.constant 0 : index
    %c0_11 = arith.constant 0 : index
    %c0_12 = arith.constant 0 : index
    %6 = vector.load %arg4[%c0_10, %c0_11, %c0_12] : memref<2x8x128xf32, #tpu.memory_space<vmem>>, vector<1x8x128xf32>
    %7 = vector.shape_cast %6 : vector<1x8x128xf32> to vector<8x128xf32>
    %c0_13 = arith.constant 0 : index
    %8 = memref.load %arg1[%c0_13] : memref<5xf32, #tpu.memory_space<smem>>
    %9 = vector.broadcast %8 : f32 to vector<8x128xf32>
    %10 = arith.mulf %9, %5 : vector<8x128xf32>
    %c1 = arith.constant 1 : index
    %11 = memref.load %arg1[%c1] : memref<5xf32, #tpu.memory_space<smem>>
    %12 = vector.broadcast %11 : f32 to vector<8x128xf32>
    %13 = arith.mulf %12, %7 : vector<8x128xf32>
    %14 = arith.addf %10, %13 : vector<8x128xf32>
    %c0_14 = arith.constant 0 : index
    %c0_15 = arith.constant 0 : index
    %c0_16 = arith.constant 0 : index
    %15 = vector.load %arg5[%c0_14, %c0_15, %c0_16] : memref<2x8x8xf32, #tpu.memory_space<vmem>>, vector<1x8x8xf32>
    %16 = vector.shape_cast %15 : vector<1x8x8xf32> to vector<8x8xf32>
    %cst = arith.constant dense<0.000000e+00> : vector<8x128xf32>
    %17 = tpu.matmul %16, %14, %cst {dimension_numbers = #tpu.dot_dimension_numbers<[1], [0], [0], [1], [0, 0, 1, 1], [], []>} : vector<8x8xf32>, vector<8x128xf32>, vector<8x128xf32> -> vector<8x128xf32>
    %c0_17 = arith.constant 0 : index
    %c0_18 = arith.constant 0 : index
    %c0_19 = arith.constant 0 : index
    %18 = vector.load %arg6[%c0_17, %c0_18, %c0_19] : memref<2x8x1xf32, #tpu.memory_space<vmem>>, vector<1x8x1xf32>
    %19 = vector.shape_cast %18 : vector<1x8x1xf32> to vector<8x1xf32>
    %20 = vector.broadcast %19 : vector<8x1xf32> to vector<8x128xf32>
    %21 = arith.addf %17, %20 : vector<8x128xf32>
    %cst_20 = arith.constant 0.000000e+00 : f32
    %22 = vector.broadcast %cst_20 : f32 to vector<8x128xf32>
    %23 = arith.maximumf %21, %22 : vector<8x128xf32>
    %c0_21 = arith.constant 0 : index
    %24 = memref.load %arg2[%c0_21] : memref<2xf32, #tpu.memory_space<smem>>
    %25 = vector.broadcast %24 : f32 to vector<8x128xf32>
    %26 = arith.mulf %25, %14 : vector<8x128xf32>
    %27 = arith.addf %26, %23 : vector<8x128xf32>
    %c2 = arith.constant 2 : index
    %28 = memref.load %arg1[%c2] : memref<5xf32, #tpu.memory_space<smem>>
    %29 = vector.broadcast %28 : f32 to vector<8x128xf32>
    %30 = arith.mulf %29, %5 : vector<8x128xf32>
    %c3 = arith.constant 3 : index
    %31 = memref.load %arg1[%c3] : memref<5xf32, #tpu.memory_space<smem>>
    %32 = vector.broadcast %31 : f32 to vector<8x128xf32>
    %33 = arith.mulf %32, %7 : vector<8x128xf32>
    %34 = arith.addf %30, %33 : vector<8x128xf32>
    %c4 = arith.constant 4 : index
    %35 = memref.load %arg1[%c4] : memref<5xf32, #tpu.memory_space<smem>>
    %36 = vector.broadcast %35 : f32 to vector<8x128xf32>
    %37 = arith.mulf %36, %27 : vector<8x128xf32>
    %38 = arith.addf %34, %37 : vector<8x128xf32>
    %c1_22 = arith.constant 1 : index
    %c0_23 = arith.constant 0 : index
    %c0_24 = arith.constant 0 : index
    %39 = vector.load %arg5[%c1_22, %c0_23, %c0_24] : memref<2x8x8xf32, #tpu.memory_space<vmem>>, vector<1x8x8xf32>
    %40 = vector.shape_cast %39 : vector<1x8x8xf32> to vector<8x8xf32>
    %cst_25 = arith.constant dense<0.000000e+00> : vector<8x128xf32>
    %41 = tpu.matmul %40, %38, %cst_25 {dimension_numbers = #tpu.dot_dimension_numbers<[1], [0], [0], [1], [0, 0, 1, 1], [], []>} : vector<8x8xf32>, vector<8x128xf32>, vector<8x128xf32> -> vector<8x128xf32>
    %c1_26 = arith.constant 1 : index
    %c0_27 = arith.constant 0 : index
    %c0_28 = arith.constant 0 : index
    %42 = vector.load %arg6[%c1_26, %c0_27, %c0_28] : memref<2x8x1xf32, #tpu.memory_space<vmem>>, vector<1x8x1xf32>
    %43 = vector.shape_cast %42 : vector<1x8x1xf32> to vector<8x1xf32>
    %44 = vector.broadcast %43 : vector<8x1xf32> to vector<8x128xf32>
    %45 = arith.addf %41, %44 : vector<8x128xf32>
    %cst_29 = arith.constant 0.000000e+00 : f32
    %46 = vector.broadcast %cst_29 : f32 to vector<8x128xf32>
    %47 = arith.maximumf %45, %46 : vector<8x128xf32>
    %c1_30 = arith.constant 1 : index
    %48 = memref.load %arg2[%c1_30] : memref<2xf32, #tpu.memory_space<smem>>
    %49 = vector.broadcast %48 : f32 to vector<8x128xf32>
    %50 = arith.mulf %49, %38 : vector<8x128xf32>
    %51 = arith.addf %50, %47 : vector<8x128xf32>
    %52 = tpu.concatenate %27, %51 in 0 : vector<8x128xf32>, vector<8x128xf32> -> vector<16x128xf32>
    %cst_31 = arith.constant dense<0.000000e+00> : vector<8x128xf32>
    %53 = tpu.matmul %2, %52, %cst_31 {dimension_numbers = #tpu.dot_dimension_numbers<[1], [0], [0], [1], [0, 0, 1, 1], [], []>} : vector<8x16xf32>, vector<16x128xf32>, vector<8x128xf32> -> vector<8x128xf32>
    %54 = vector.broadcast %3 : vector<8x1xf32> to vector<8x128xf32>
    %55 = arith.addf %53, %54 : vector<8x128xf32>
    %cst_32 = arith.constant 0.000000e+00 : f32
    %56 = vector.broadcast %cst_32 : f32 to vector<8x128xf32>
    %57 = arith.maximumf %55, %56 : vector<8x128xf32>
    %58 = arith.addf %57, %5 : vector<8x128xf32>
    %cst_33 = arith.constant dense<0.000000e+00> : vector<128xf32>
    %59 = vector.multi_reduction <add>, %58, %cst_33 [0] : vector<8x128xf32> to vector<128xf32>
    %60 = vector.shape_cast %59 : vector<128xf32> to vector<1x128xf32>
    %61 = arith.mulf %58, %58 : vector<8x128xf32>
    %cst_34 = arith.constant dense<0.000000e+00> : vector<128xf32>
    %62 = vector.multi_reduction <add>, %61, %cst_34 [0] : vector<8x128xf32> to vector<128xf32>
    %63 = vector.shape_cast %62 : vector<128xf32> to vector<1x128xf32>
    %64 = vector.shape_cast %60 : vector<1x128xf32> to vector<1x1x128xf32>
    %cst_35 = arith.constant dense<0.000000e+00> : vector<1xf32>
    %65 = vector.multi_reduction <add>, %64, %cst_35 [1, 2] : vector<1x1x128xf32> to vector<1xf32>
    %66 = vector.shape_cast %65 : vector<1xf32> to vector<1x1x1xf32>
    %67 = vector.extract %66[0, 0, 0] : f32 from vector<1x1x1xf32>
    %cst_36 = arith.constant 9.765625E-4 : f32
    %68 = arith.mulf %67, %cst_36 : f32
    %69 = vector.shape_cast %63 : vector<1x128xf32> to vector<1x1x128xf32>
    %cst_37 = arith.constant dense<0.000000e+00> : vector<1xf32>
    %70 = vector.multi_reduction <add>, %69, %cst_37 [1, 2] : vector<1x1x128xf32> to vector<1xf32>
    %71 = vector.shape_cast %70 : vector<1xf32> to vector<1x1x1xf32>
    %72 = vector.extract %71[0, 0, 0] : f32 from vector<1x1x1xf32>
    %cst_38 = arith.constant 9.765625E-4 : f32
    %73 = arith.mulf %72, %cst_38 : f32
    %74 = arith.mulf %68, %68 : f32
    %75 = arith.subf %73, %74 : f32
    %cst_39 = arith.constant 0.000000e+00 : f32
    %76 = arith.maximumf %75, %cst_39 : f32
    %77 = vector.broadcast %68 : f32 to vector<8x128xf32>
    %78 = arith.subf %58, %77 : vector<8x128xf32>
    %cst_40 = arith.constant 9.99999974E-6 : f32
    %79 = arith.addf %76, %cst_40 : f32
    %80 = math.rsqrt %79 : f32
    %81 = vector.broadcast %80 : f32 to vector<8x128xf32>
    %82 = arith.mulf %78, %81 : vector<8x128xf32>
    %83 = arith.mulf %82, %0 : vector<8x128xf32>
    %84 = arith.addf %83, %1 : vector<8x128xf32>
    %c0_41 = arith.constant 0 : index
    %c0_42 = arith.constant 0 : index
    %c0_43 = arith.constant 0 : index
    %85 = vector.load %arg11[%c0_41, %c0_42, %c0_43] : memref<2x8x128xf32, #tpu.memory_space<vmem>>, vector<1x8x128xf32>
    %86 = vector.shape_cast %85 : vector<1x8x128xf32> to vector<8x128xf32>
    %87 = vector.shape_cast %84 : vector<8x128xf32> to vector<1x8x128xf32>
    tpu.vector_store %arg11[%c0_41, %c0_42, %c0_43], %87 {strides = array<i32>} : memref<2x8x128xf32, #tpu.memory_space<vmem>>, vector<1x8x128xf32>,
    %c1_44 = arith.constant 1 : index
    %c0_45 = arith.constant 0 : index
    %c0_46 = arith.constant 0 : index
    %88 = vector.load %arg3[%c1_44, %c0_45, %c0_46] : memref<2x8x128xf32, #tpu.memory_space<vmem>>, vector<1x8x128xf32>
    %89 = vector.shape_cast %88 : vector<1x8x128xf32> to vector<8x128xf32>
    %c1_47 = arith.constant 1 : index
    %c0_48 = arith.constant 0 : index
    %c0_49 = arith.constant 0 : index
    %90 = vector.load %arg4[%c1_47, %c0_48, %c0_49] : memref<2x8x128xf32, #tpu.memory_space<vmem>>, vector<1x8x128xf32>
    %91 = vector.shape_cast %90 : vector<1x8x128xf32> to vector<8x128xf32>
    %c0_50 = arith.constant 0 : index
    %92 = memref.load %arg1[%c0_50] : memref<5xf32, #tpu.memory_space<smem>>
    %93 = vector.broadcast %92 : f32 to vector<8x128xf32>
    %94 = arith.mulf %93, %89 : vector<8x128xf32>
    %c1_51 = arith.constant 1 : index
    %95 = memref.load %arg1[%c1_51] : memref<5xf32, #tpu.memory_space<smem>>
    %96 = vector.broadcast %95 : f32 to vector<8x128xf32>
    %97 = arith.mulf %96, %91 : vector<8x128xf32>
    %98 = arith.addf %94, %97 : vector<8x128xf32>
    %c0_52 = arith.constant 0 : index
    %c0_53 = arith.constant 0 : index
    %c0_54 = arith.constant 0 : index
    %99 = vector.load %arg5[%c0_52, %c0_53, %c0_54] : memref<2x8x8xf32, #tpu.memory_space<vmem>>, vector<1x8x8xf32>
    %100 = vector.shape_cast %99 : vector<1x8x8xf32> to vector<8x8xf32>
    %cst_55 = arith.constant dense<0.000000e+00> : vector<8x128xf32>
    %101 = tpu.matmul %100, %98, %cst_55 {dimension_numbers = #tpu.dot_dimension_numbers<[1], [0], [0], [1], [0, 0, 1, 1], [], []>} : vector<8x8xf32>, vector<8x128xf32>, vector<8x128xf32> -> vector<8x128xf32>
    %c0_56 = arith.constant 0 : index
    %c0_57 = arith.constant 0 : index
    %c0_58 = arith.constant 0 : index
    %102 = vector.load %arg6[%c0_56, %c0_57, %c0_58] : memref<2x8x1xf32, #tpu.memory_space<vmem>>, vector<1x8x1xf32>
    %103 = vector.shape_cast %102 : vector<1x8x1xf32> to vector<8x1xf32>
    %104 = vector.broadcast %103 : vector<8x1xf32> to vector<8x128xf32>
    %105 = arith.addf %101, %104 : vector<8x128xf32>
    %cst_59 = arith.constant 0.000000e+00 : f32
    %106 = vector.broadcast %cst_59 : f32 to vector<8x128xf32>
    %107 = arith.maximumf %105, %106 : vector<8x128xf32>
    %c0_60 = arith.constant 0 : index
    %108 = memref.load %arg2[%c0_60] : memref<2xf32, #tpu.memory_space<smem>>
    %109 = vector.broadcast %108 : f32 to vector<8x128xf32>
    %110 = arith.mulf %109, %98 : vector<8x128xf32>
    %111 = arith.addf %110, %107 : vector<8x128xf32>
    %c2_61 = arith.constant 2 : index
    %112 = memref.load %arg1[%c2_61] : memref<5xf32, #tpu.memory_space<smem>>
    %113 = vector.broadcast %112 : f32 to vector<8x128xf32>
    %114 = arith.mulf %113, %89 : vector<8x128xf32>
    %c3_62 = arith.constant 3 : index
    %115 = memref.load %arg1[%c3_62] : memref<5xf32, #tpu.memory_space<smem>>
    %116 = vector.broadcast %115 : f32 to vector<8x128xf32>
    %117 = arith.mulf %116, %91 : vector<8x128xf32>
    %118 = arith.addf %114, %117 : vector<8x128xf32>
    %c4_63 = arith.constant 4 : index
    %119 = memref.load %arg1[%c4_63] : memref<5xf32, #tpu.memory_space<smem>>
    %120 = vector.broadcast %119 : f32 to vector<8x128xf32>
    %121 = arith.mulf %120, %111 : vector<8x128xf32>
    %122 = arith.addf %118, %121 : vector<8x128xf32>
    %c1_64 = arith.constant 1 : index
    %c0_65 = arith.constant 0 : index
    %c0_66 = arith.constant 0 : index
    %123 = vector.load %arg5[%c1_64, %c0_65, %c0_66] : memref<2x8x8xf32, #tpu.memory_space<vmem>>, vector<1x8x8xf32>
    %124 = vector.shape_cast %123 : vector<1x8x8xf32> to vector<8x8xf32>
    %cst_67 = arith.constant dense<0.000000e+00> : vector<8x128xf32>
    %125 = tpu.matmul %124, %122, %cst_67 {dimension_numbers = #tpu.dot_dimension_numbers<[1], [0], [0], [1], [0, 0, 1, 1], [], []>} : vector<8x8xf32>, vector<8x128xf32>, vector<8x128xf32> -> vector<8x128xf32>
    %c1_68 = arith.constant 1 : index
    %c0_69 = arith.constant 0 : index
    %c0_70 = arith.constant 0 : index
    %126 = vector.load %arg6[%c1_68, %c0_69, %c0_70] : memref<2x8x1xf32, #tpu.memory_space<vmem>>, vector<1x8x1xf32>
    %127 = vector.shape_cast %126 : vector<1x8x1xf32> to vector<8x1xf32>
    %128 = vector.broadcast %127 : vector<8x1xf32> to vector<8x128xf32>
    %129 = arith.addf %125, %128 : vector<8x128xf32>
    %cst_71 = arith.constant 0.000000e+00 : f32
    %130 = vector.broadcast %cst_71 : f32 to vector<8x128xf32>
    %131 = arith.maximumf %129, %130 : vector<8x128xf32>
    %c1_72 = arith.constant 1 : index
    %132 = memref.load %arg2[%c1_72] : memref<2xf32, #tpu.memory_space<smem>>
    %133 = vector.broadcast %132 : f32 to vector<8x128xf32>
    %134 = arith.mulf %133, %122 : vector<8x128xf32>
    %135 = arith.addf %134, %131 : vector<8x128xf32>
    %136 = tpu.concatenate %111, %135 in 0 : vector<8x128xf32>, vector<8x128xf32> -> vector<16x128xf32>
    %cst_73 = arith.constant dense<0.000000e+00> : vector<8x128xf32>
    %137 = tpu.matmul %2, %136, %cst_73 {dimension_numbers = #tpu.dot_dimension_numbers<[1], [0], [0], [1], [0, 0, 1, 1], [], []>} : vector<8x16xf32>, vector<16x128xf32>, vector<8x128xf32> -> vector<8x128xf32>
    %138 = vector.broadcast %3 : vector<8x1xf32> to vector<8x128xf32>
    %139 = arith.addf %137, %138 : vector<8x128xf32>
    %cst_74 = arith.constant 0.000000e+00 : f32
    %140 = vector.broadcast %cst_74 : f32 to vector<8x128xf32>
    %141 = arith.maximumf %139, %140 : vector<8x128xf32>
    %142 = arith.addf %141, %89 : vector<8x128xf32>
    %cst_75 = arith.constant dense<0.000000e+00> : vector<128xf32>
    %143 = vector.multi_reduction <add>, %142, %cst_75 [0] : vector<8x128xf32> to vector<128xf32>
    %144 = vector.shape_cast %143 : vector<128xf32> to vector<1x128xf32>
    %145 = arith.mulf %142, %142 : vector<8x128xf32>
    %cst_76 = arith.constant dense<0.000000e+00> : vector<128xf32>
    %146 = vector.multi_reduction <add>, %145, %cst_76 [0] : vector<8x128xf32> to vector<128xf32>
    %147 = vector.shape_cast %146 : vector<128xf32> to vector<1x128xf32>
    %148 = vector.shape_cast %144 : vector<1x128xf32> to vector<1x1x128xf32>
    %cst_77 = arith.constant dense<0.000000e+00> : vector<1xf32>
    %149 = vector.multi_reduction <add>, %148, %cst_77 [1, 2] : vector<1x1x128xf32> to vector<1xf32>
    %150 = vector.shape_cast %149 : vector<1xf32> to vector<1x1x1xf32>
    %151 = vector.extract %150[0, 0, 0] : f32 from vector<1x1x1xf32>
    %cst_78 = arith.constant 9.765625E-4 : f32
    %152 = arith.mulf %151, %cst_78 : f32
    %153 = vector.shape_cast %147 : vector<1x128xf32> to vector<1x1x128xf32>
    %cst_79 = arith.constant dense<0.000000e+00> : vector<1xf32>
    %154 = vector.multi_reduction <add>, %153, %cst_79 [1, 2] : vector<1x1x128xf32> to vector<1xf32>
    %155 = vector.shape_cast %154 : vector<1xf32> to vector<1x1x1xf32>
    %156 = vector.extract %155[0, 0, 0] : f32 from vector<1x1x1xf32>
    %cst_80 = arith.constant 9.765625E-4 : f32
    %157 = arith.mulf %156, %cst_80 : f32
    %158 = arith.mulf %152, %152 : f32
    %159 = arith.subf %157, %158 : f32
    %cst_81 = arith.constant 0.000000e+00 : f32
    %160 = arith.maximumf %159, %cst_81 : f32
    %161 = vector.broadcast %152 : f32 to vector<8x128xf32>
    %162 = arith.subf %142, %161 : vector<8x128xf32>
    %cst_82 = arith.constant 9.99999974E-6 : f32
    %163 = arith.addf %160, %cst_82 : f32
    %164 = math.rsqrt %163 : f32
    %165 = vector.broadcast %164 : f32 to vector<8x128xf32>
    %166 = arith.mulf %162, %165 : vector<8x128xf32>
    %167 = arith.mulf %166, %0 : vector<8x128xf32>
    %168 = arith.addf %167, %1 : vector<8x128xf32>
    %c1_83 = arith.constant 1 : index
    %c0_84 = arith.constant 0 : index
    %c0_85 = arith.constant 0 : index
    %169 = vector.load %arg11[%c1_83, %c0_84, %c0_85] : memref<2x8x128xf32, #tpu.memory_space<vmem>>, vector<1x8x128xf32>
    %170 = vector.shape_cast %169 : vector<1x8x128xf32> to vector<8x128xf32>
    %171 = vector.shape_cast %168 : vector<8x128xf32> to vector<1x8x128xf32>
    tpu.vector_store %arg11[%c1_83, %c0_84, %c0_85], %171 {strides = array<i32>} : memref<2x8x128xf32, #tpu.memory_space<vmem>>, vector<1x8x128xf32>,
    return
  }
  func.func @transform_0(%arg0: i32) -> i32 {
    %c0_i32 = arith.constant 0 : i32
    %c0_i32_0 = arith.constant 0 : i32
    return %c0_i32 : i32
  }
  func.func @transform_1(%arg0: i32) -> i32 {
    %c0_i32 = arith.constant 0 : i32
    %c0_i32_0 = arith.constant 0 : i32
    return %c0_i32 : i32
  }
  func.func @transform_2(%arg0: i32) -> (i32, i32, i32) {
    %c0_i32 = arith.constant 0 : i32
    %c0_i32_0 = arith.constant 0 : i32
    %c0_i32_1 = arith.constant 0 : i32
    return %arg0, %c0_i32, %c0_i32_0 : i32, i32, i32
  }
  func.func @transform_3(%arg0: i32) -> (i32, i32, i32) {
    %c0_i32 = arith.constant 0 : i32
    %c0_i32_0 = arith.constant 0 : i32
    %c0_i32_1 = arith.constant 0 : i32
    return %arg0, %c0_i32, %c0_i32_0 : i32, i32, i32
  }
  func.func @transform_4(%arg0: i32) -> (i32, i32, i32) {
    %c0_i32 = arith.constant 0 : i32
    %c0_i32_0 = arith.constant 0 : i32
    %c0_i32_1 = arith.constant 0 : i32
    %c0_i32_2 = arith.constant 0 : i32
    return %c0_i32, %c0_i32_0, %c0_i32_1 : i32, i32, i32
  }
  func.func @transform_5(%arg0: i32) -> (i32, i32, i32) {
    %c0_i32 = arith.constant 0 : i32
    %c0_i32_0 = arith.constant 0 : i32
    %c0_i32_1 = arith.constant 0 : i32
    %c0_i32_2 = arith.constant 0 : i32
    return %c0_i32, %c0_i32_0, %c0_i32_1 : i32, i32, i32
  }
  func.func @transform_6(%arg0: i32) -> (i32, i32) {
    %c0_i32 = arith.constant 0 : i32
    %c0_i32_0 = arith.constant 0 : i32
    %c0_i32_1 = arith.constant 0 : i32
    return %c0_i32, %c0_i32_0 : i32, i32
  }
  func.func @transform_7(%arg0: i32) -> (i32, i32) {
    %c0_i32 = arith.constant 0 : i32
    %c0_i32_0 = arith.constant 0 : i32
    %c0_i32_1 = arith.constant 0 : i32
    return %c0_i32, %c0_i32_0 : i32, i32
  }
  func.func @transform_8(%arg0: i32) -> (i32, i32) {
    %c0_i32 = arith.constant 0 : i32
    %c0_i32_0 = arith.constant 0 : i32
    %c0_i32_1 = arith.constant 0 : i32
    return %c0_i32, %c0_i32_0 : i32, i32
  }
  func.func @transform_9(%arg0: i32) -> (i32, i32) {
    %c0_i32 = arith.constant 0 : i32
    %c0_i32_0 = arith.constant 0 : i32
    %c0_i32_1 = arith.constant 0 : i32
    return %c0_i32, %c0_i32_0 : i32, i32
  }
  func.func @transform_10(%arg0: i32) -> (i32, i32, i32) {
    %c0_i32 = arith.constant 0 : i32
    %c0_i32_0 = arith.constant 0 : i32
    %c0_i32_1 = arith.constant 0 : i32
    return %arg0, %c0_i32, %c0_i32_0 : i32, i32, i32
  }
}

</mosaic_0001>

<bundles_post_ra>
// kernel: tpu_custom_call.1
= control target key start
LH: loop header
LB: loop body
LE: loop exit
PB: predicated region body
PF: predicated region fallthrough
CT: control target
= control target key end

     0   :  { %15 = vsyncpa [#allocation6], 0  ;;  %s1123_s0 = inlined_call_operand.vmem [shape: f32[5], index: 0, kind: input, shape index: {}]   ;;  %s1124_s1 = inlined_call_operand.hbm [shape: f32[2], index: 1, kind: input, shape index: {}]   ;;  %s1125_s2 = inlined_call_operand.vmem [shape: f32[2,8,128], index: 2, kind: input, shape index: {}]   ;;  %s1126_s3 = inlined_call_operand.vmem [shape: f32[2,8,128], index: 3, kind: input, shape index: {}]   ;;  %s1127_s4 = inlined_call_operand.hbm [shape: f32[2,8,8], index: 4, kind: input, shape index: {}]   ;;  %s1128_s5 = inlined_call_operand.vmem [shape: f32[2,8,1], index: 5, kind: input, shape index: {}]   ;;  %s1129_s6 = inlined_call_operand.vmem [shape: f32[8,16], index: 6, kind: input, shape index: {}]   ;;  %s1130_s7 = inlined_call_operand.vmem [shape: f32[8,1], index: 7, kind: input, shape index: {}]   ;;  %s1131_s8 = inlined_call_operand.vmem [shape: f32[8,128], index: 8, kind: input, shape index: {}]   ;;  %s1132_s9 = inlined_call_operand.vmem [shape: f32[8,128], index: 9, kind: input, shape index: {}]   ;;  %s1133_s10 = inlined_call_operand.hbm [shape: f32[2,8,128], index: 10, kind: output, shape index: {}]  }
   0x1   :  { %16 = vsyncpa [#allocation5], 0 }
   0x2   :  { %17 = vsyncpa [#allocation3], 0 }
   0x3   :  { %18 = vsyncpa [#allocation4], 0  ;;  %s25_s15 = sshll.u32 %s1123_s0, 4  ;;  %s26_s15 = int_to_ptr.vmem [resolvable:$true] %s25_s15 }
   0x4   :  { %s837_s16 = scalar_lea.vmem %s26_s15, 16  ;;  %p842_p1 = scmp.lt.s32.totalorder %s26_s15, %s26_s15 }
   0x5   :  { %p838_p0 = scmp.ne.s32.totalorder %s26_s15, %s837_s16  ;;  %p843_p2 = scmp.lt.s32.totalorder %s837_s16, %s837_s16 }
   0x7   :  { %p844_p3 = por %p843_p2, %p842_p1 }
   0x9   :  { %p845_p4 = pnand %p844_p3, %p838_p0 }
   0xb   :  { %848 = shalt.err (!%p845_p4)
}
   0xc   :  { %s911_s17 = smov [#allocation2]   ;;  %s849_s20 = scalar_lea.hbm %s1124_s1, 16 }
   0xd   :  { %28 = dma.vmem_to_smem %s26_s15, 16, %s911_s17, [#allocation6]  }
   0xe   :  { %p850_p5 = scmp.ne.s32.totalorder %s1124_s1, %s849_s20  ;;  %p853_p6 = scmp.lt.u32.totalorder %s849_s20, %s1124_s1 }
  0x10   :  { %p855_p7 = pnand %p853_p6, %p850_p5 }
  0x12   :  { %858 = shalt.err (!%p855_p7)
}
  0x13   :  { %s912_s24 = smov [#allocation7]   ;;  %s913_s27 = smov [#allocation8]  }
  0x14   :  { %36 = dma.hbm_to_smem %s1124_s1, 16, %s912_s24, [#allocation5]  }
  0x15   :  { %s46_s28 = sshll.u32 %s913_s27, 4  ;;  %s859_s11 = scalar_lea.hbm %s1127_s4, 256  ;;  %s47_s28 = int_to_ptr.vmem [resolvable:$true] %s46_s28 }
  0x16   :  { %p860_p8 = scmp.ne.s32.totalorder %s1127_s4, %s859_s11  ;;  %p863_p9 = scmp.lt.u32.totalorder %s859_s11, %s1127_s4 }
  0x18   :  { %p865_p10 = pnand %p863_p9, %p860_p8 }
  0x1a   :  { %868 = shalt.err (!%p865_p10)
}
  0x1b   :  { %s869_s16 = scalar_lea.vmem %s47_s28, 256  ;;  %p874_p12 = scmp.lt.s32.totalorder %s47_s28, %s47_s28 }
  0x1c   :  { %p870_p11 = scmp.ne.s32.totalorder %s47_s28, %s869_s16  ;;  %p875_p13 = scmp.lt.s32.totalorder %s869_s16, %s869_s16 }
  0x1e   :  { %p876_p0 = por %p875_p13, %p874_p12 }
  0x20   :  { %p877_p1 = pnand %p876_p0, %p870_p11 }
  0x22   :  { %880 = shalt.err (!%p877_p1)
}
  0x23   :  { %s914_s1 = smov 128   ;;  %s915_s17 = smov 8  }
  0x24   :  { %52 = dma.hbm_to_vmem [thread:$0]  %s1127_s4, 256, %s47_s28, [#allocation3], %s914_s1, %s914_s1, %s915_s17  }
  0x25   :  { %903 = dma.done.wait [#allocation6], 16  }
  0x26   :  { %904 = vsyncadd [#allocation6], 4294967280 }
  0x27   :  { %905 = dma.done.wait [#allocation5], 16  }
  0x28   :  { %906 = vsyncadd [#allocation5], 4294967280 }
  0x29   :  { %907 = dma.done.wait [#allocation3], 256  }
  0x2a   :  { %908 = vsyncadd [#allocation3], 4294967040 }
  0x2b   :  { %72 = sfence }
  0x2c   :  { %s1007_s20 = sld [smem:[#allocation2]]  ;;  %v916_v0 = vmov 0.0   ;;  %s1010_s21 = sld [smem:[#allocation2 + $0x1]]  ;;  %vm917_vm0 = vmmov 0   ;;  %v87_v1 = vld [vmem:[%s1128_s5] sm:$0xff]  ;;  %v918_v2 = vmov 0  }
  0x2d   :  { %768 = vmatprep.subr.mxu0 %v916_v0  ;;  %770 = vmatprep.mubr.msk.f32.mxu0 %vm917_vm0, %v916_v0  ;;  %v1023_v3 = vld [vmem:[%s1125_s2] sm:$0xff]  ;;  %v739_v5 = vld [vmem:[%s1128_s5 + $0x8] sm:$0xff]  ;;  %vm93_vm1 = vcmask 64512   ;;  %s1040_s5 = sld [smem:[#allocation7]]  ;;  %s1042_s30 = sld [smem:[#allocation2 + $0x2]]  ;;  %v919_v35 = vmov 0.0|0.0  }
  0x2e   :  { %773 = vmatprep.subr.mxu1 %v916_v0  ;;  %775 = vmatprep.mubr.msk.f32.mxu1 %vm917_vm0, %v916_v0  ;;  %v78_v4 = vld [vmem:[%s1126_s3] sm:$0xff]  ;;  %s1044_s11 = sld [smem:[#allocation2 + $0x3]]  ;;  %v1055_v23 = vld [vmem:[%s1125_s2 + $0x8] sm:$0xff]  ;;  %s1069_s2 = sld [smem:[#allocation7 + $0x1]]  ;;  %vm275_vm2 = vcmask 130048   ;;  %vm364_vm3 = vcmask 1040384  }
  0x2f   :  { %831 = vset.pattern.permute.xlu0 %v918_v2  ;;  %832 = vset.pattern.permute.xlu1 %v918_v2  ;;  %v76_v10 = vld [vmem:[%s1130_s7] sm:$0xff]  ;;  %s1046_s7 = sld [smem:[#allocation2 + $0x4]]  ;;  %v744_v24 = vld [vmem:[%s1126_s3 + $0x8] sm:$0xff]  ;;  %s920_s22 = smov 0.0  }
  0x30   :  { %90 = vperm.xlu0 %831, %v87_v1   ;;  %416 = vperm.xlu1 %832, %v87_v1   ;;  %v86_v12 = vld [vmem:[#allocation8] sm:$0xff]  ;;  %v184_v33 = vld [vmem:[#allocation8 + $0x8] sm:$0xff]  ;;  %s921_s14 = smov [#allocation9]  }
  0x31   :  { %v75_v55 = vld [vmem:[%s1129_s6] sm:$0xff]  ;;  %s720_s15 = sshll.u32 %s921_s14, 4  ;;  %s721_s15 = int_to_ptr.vmem [resolvable:$true] %s720_s15 }
  0x32   :  { %v80_v6 = vstv %s1007_s20  ;;  %v83_v8 = vstv %s1010_s21  ;;  %p886_p3 = scmp.lt.s32.totalorder %s721_s15, %s721_s15 }
  0x33   :  { %v81_v7 = vmul.f32 %v80_v6, %v1023_v3  ;;  %v84_v9 = vmul.f32 %v83_v8, %v78_v4  ;;  %v169_v13 = vstv %s1040_s5  ;;  %v173_v14 = vstv %s1042_s30 }
  0x34   :  { %189 = vperm.xlu0 %831, %v739_v5   ;;  %512 = vperm.xlu1 %832, %v739_v5   ;;  %v176_v15 = vstv %s1044_s11  ;;  %v174_v21 = vmul.f32 %v173_v14, %v1023_v3  ;;  %v407_v29 = vmul.f32 %v1055_v23, %v80_v6  ;;  %v410_v30 = vmul.f32 %v744_v24, %v83_v8 }
  0x35   :  { %v85_v11 = vadd.f32 %v84_v9, %v81_v7  ;;  %v177_v22 = vmul.f32 %v176_v15, %v78_v4  ;;  %v180_v26 = vstv %s1046_s7  ;;  %v267_v37 = vstv %s1069_s2  ;;  %s881_s2 = scalar_lea.vmem %s721_s15, 256 }
  0x36   :  { %v411_v34 = vadd.f32 %v410_v30, %v407_v29  ;;  %v499_v48 = vmul.f32 %v1055_v23, %v173_v14  ;;  %v502_v49 = vmul.f32 %v744_v24, %v176_v15  ;;  %p882_p2 = scmp.ne.s32.totalorder %s721_s15, %s881_s2  ;;  %p887_p4 = scmp.lt.s32.totalorder %s881_s2, %s881_s2 }
  0x37   :  { %769 = vmatpush3.msra.mxu0 %v85_v11  ;;  %v170_v18 = vmul.f32 %v169_v13, %v85_v11  ;;  %v178_v28 = vadd.f32 %v177_v22, %v174_v21 }
  0x38   :  { %272 = vperm.xlu0 %831, %v76_v10   ;;  %771 = vmatmul.mubr.msk.f32.vlgmr.msra.gmra.mrb[0].mxu0 %vm93_vm1, %v86_v12  ;;  %v495_v45 = vmul.f32 %v411_v34, %v169_v13  ;;  %v503_v54 = vadd.f32 %v502_v49, %v499_v48  ;;  %p888_p5 = por %p887_p4, %p886_p3 }
  0x39   :  { %782 = vmatprep.mubr.msk.f32.mxu0 %vm917_vm0, %v916_v0  ;;  %802 = vmatprep.subr.bf16.mxu0 %v919_v35 }
  0x3a   :  { %p889_p6 = pnand %p888_p5, %p882_p2 }
  0xaf   :  { %v91_v16 = vpop.permute.xlu0 %90  ;;  %v417_v43 = vpop.permute.xlu1 %416 }
  0xb3   :  { %v190_v36 = vpop.permute.xlu0 %189  ;;  %v513_v63 = vpop.permute.xlu1 %512 }
  0xb7   :  { %v273_v58 = vpop.permute.xlu0 %272 }
 0x10b   :  { %v163_v17 = vpop.f32.mrb[0].mxu0 }
 0x10c   :  { %v164_v19 = vadd.f32 %v163_v17, %v91_v16  ;;  %v772_v20 = vpop.f32.mrb[1].mxu0 }
 0x10e   :  { %v167_v25 = vmax.f32 %v164_v19, 0.0 }
 0x110   :  { %v171_v27 = vadd.f32 %v170_v18, %v167_v25 }
 0x112   :  { %v181_v31 = vmul.f32 %v180_v26, %v171_v27 }
 0x114   :  { %v182_v32 = vadd.f32 %v181_v31, %v178_v28 }
 0x116   :  { %774 = vmatpush3.msra.mxu1 %v182_v32  ;;  %v268_v41 = vmul.f32 %v267_v37, %v182_v32 }
 0x117   :  { %776 = vmatmul.mubr.msk.f32.vlgmr.msra.gmra.mrb[0].mxu1 %vm93_vm1, %v184_v33  ;;  %785 = vmatprep.subr.mxu1 %v916_v0 }
 0x118   :  { %786 = vmatpush3.msra.mxu1 %v411_v34  ;;  %787 = vmatprep.mubr.msk.f32.mxu1 %vm917_vm0, %v916_v0 }
 0x119   :  { %805 = vmatprep.subr.bf16.mxu1 %v919_v35 }
 0x11b   :  { %788 = vmatmul.mubr.msk.f32.vlgmr.msra.gmra.mrb[2].mxu1 %vm93_vm1, %v86_v12 }
 0x11c   :  { %799 = vmatprep.mubr.msk.f32.mxu1 %vm917_vm0, %v916_v0 }
 0x1ea   :  { %v261_v38 = vpop.f32.mrb[0].mxu1 }
 0x1eb   :  { %v262_v39 = vadd.f32 %v261_v38, %v190_v36  ;;  %v777_v40 = vpop.f32.mrb[1].mxu1 }
 0x1ed   :  { %v265_v42 = vmax.f32 %v262_v39, 0.0 }
 0x1ee   :  { %v488_v44 = vpop.f32.mrb[2].mxu1 }
 0x1ef   :  { %v269_v46 = vadd.f32 %v268_v41, %v265_v42  ;;  %v489_v47 = vadd.f32 %v488_v44, %v417_v43  ;;  %v789_v50 = vpop.f32.mrb[3].mxu1 }
 0x1f1   :  { %v803_v51 = vpack.c.bf16 %v269_v46, %v171_v27  ;;  %v492_v52 = vmax.f32 %v489_v47, 0.0 }
 0x1f3   :  { %v496_v53 = vadd.f32 %v495_v45, %v492_v52  ;;  %804 = vmatpush3.bf16.msra.mxu0 %v803_v51 }
 0x1f4   :  { %790 = vmatprep.subr.mxu0 %v916_v0 }
 0x1f5   :  { %v506_v56 = vmul.f32 %v496_v53, %v180_v26 }
 0x1f6   :  { %783 = vmatmul.mubr.msk.f32.vlgmr.msra.gmra.mrb[2].mxu0 %vm275_vm2, %v75_v55 }
 0x1f7   :  { %v507_v57 = vadd.f32 %v506_v56, %v503_v54  ;;  %792 = vmatprep.mubr.msk.f32.mxu0 %vm917_vm0, %v916_v0 }
 0x1f9   :  { %791 = vmatpush3.msra.mxu0 %v507_v57  ;;  %v591_v7 = vmul.f32 %v507_v57, %v267_v37 }
 0x1fa   :  { %793 = vmatmul.mubr.msk.f32.vlgmr.msra.gmra.mrb[4].mxu0 %vm93_vm1, %v184_v33 }
 0x2c9   :  { %v345_v59 = vpop.f32.mrb[2].mxu0 }
 0x2ca   :  { %v346_v60 = vadd.f32 %v345_v59, %v273_v58  ;;  %v784_v61 = vpop.f32.mrb[3].mxu0 }
 0x2cb   :  { %v73_v61 = vld [vmem:[%s1131_s8] sm:$0xff] }
 0x2cc   :  { %v349_v62 = vmax.f32 %v346_v60, 0.0 }
 0x2cd   :  { %v584_v1 = vpop.f32.mrb[4].mxu0 }
 0x2ce   :  { %v1082_v2 = vadd.f32 %v349_v62, %v1023_v3  ;;  %v585_v4 = vadd.f32 %v584_v1, %v513_v63  ;;  %v794_v5 = vpop.f32.mrb[5].mxu0  ;;  %v74_v1 = vld [vmem:[%s1132_s9] sm:$0xff] }
 0x2d0   :  { %v588_v6 = vmax.f32 %v585_v4, 0.0  ;;  %v351_v8 = vrot.slane %v1082_v2, 4  ;;  %v357_v0 = vmul.f32 %v1082_v2, %v1082_v2 }
 0x2d2   :  { %v592_v9 = vadd.f32 %v591_v7, %v588_v6  ;;  %v352_v10 = vadd.f32 %v351_v8, %v1082_v2  ;;  %v358_v11 = vrot.slane %v357_v0, 4 }
 0x2d4   :  { %v806_v12 = vpack.c.bf16 %v592_v9, %v496_v53  ;;  %v353_v13 = vrot.slane %v352_v10, 2  ;;  %v359_v14 = vadd.f32 %v358_v11, %v357_v0 }
 0x2d6   :  { %807 = vmatpush3.bf16.msra.mxu1 %v806_v12  ;;  %v354_v15 = vadd.f32 %v353_v13, %v352_v10  ;;  %v360_v3 = vrot.slane %v359_v14, 2 }
 0x2d8   :  { %v355_v16 = vrot.slane %v354_v15, 1  ;;  %v361_v17 = vadd.f32 %v360_v3, %v359_v14 }
 0x2d9   :  { %800 = vmatmul.mubr.msk.f32.vlgmr.msra.gmra.mrb[4].mxu1 %vm275_vm2, %v75_v55 }
 0x2da   :  { %v356_v18 = vadd.f32 %v355_v16, %v354_v15  ;;  %v362_v19 = vrot.slane %v361_v17, 1 }
 0x2dc   :  { %v365_v20 = vsel %vm364_vm3, %v356_v18, 0.0  ;;  %v363_v21 = vadd.f32 %v362_v19, %v361_v17 }
 0x2dd   :  { %366 = vadd.xlane.f32.xlu1 %v365_v20 }
 0x2de   :  { %v376_v22 = vsel %vm364_vm3, %v363_v21, 0.0 }
 0x2df   :  { %377 = vadd.xlane.f32.xlu0 %v376_v22 }
 0x36a   :  { %v367_v24 = vpop.xlane.xlu1 %366 }
 0x36b   :  { %v368_v25 = vrot.slane %v367_v24, 4 }
 0x36c   :  { %v378_v26 = vpop.xlane.xlu0 %377 }
 0x36d   :  { %v369_v27 = vadd.f32 %v368_v25, %v367_v24  ;;  %v379_v28 = vrot.slane %v378_v26, 4 }
 0x36f   :  { %v370_v29 = vrot.slane %v369_v27, 2  ;;  %v380_v30 = vadd.f32 %v379_v28, %v378_v26 }
 0x371   :  { %v381_v31 = vrot.slane %v380_v30, 2  ;;  %v371_v32 = vadd.f32 %v370_v29, %v369_v27 }
 0x373   :  { %v372_v33 = vrot.slane %v371_v32, 1  ;;  %v382_v34 = vadd.f32 %v381_v31, %v380_v30 }
 0x375   :  { %v373_v35 = vadd.f32 %v372_v33, %v371_v32  ;;  %v383_v36 = vrot.slane %v382_v34, 1 }
 0x377   :  { %808 = vpush %v373_v35  ;;  %v384_v37 = vadd.f32 %v383_v36, %v382_v34 }
 0x379   :  { %810 = vpush %v384_v37 }
 0x3a8   :  { %s809_s6 = spop %808 }
 0x3a9   :  { %s1091_s18 = smul.f32 0.0009765625, %s809_s6 }
 0x3aa   :  { %s811_s19 = spop %810 }
 0x3ab   :  { %s387_s20 = smul.f32 %s1091_s18, %s1091_s18  ;;  %v390_v59 = vstv %s1091_s18 }
 0x3ac   :  { %s386_s21 = smul.f32 0.0009765625, %s811_s19  ;;  %v659_v38 = vpop.f32.mrb[4].mxu1  ;;  %v391_v60 = vsub.f32 %v1082_v2, %v390_v59 }
 0x3ad   :  { %v660_v39 = vadd.f32 %v659_v38, %v273_v58  ;;  %v801_v40 = vpop.f32.mrb[5].mxu1 }
 0x3ae   :  { %s388_s4 = ssub.f32 %s386_s21, %s387_s20 }
 0x3af   :  { %v663_v41 = vmax.f32 %v660_v39, 0.0 }
 0x3b0   :  { %s389_s23 = smax.f32 %s920_s22, %s388_s4 }
 0x3b1   :  { %s392_s0 = sadd.f32 1e-05, %s389_s23  ;;  %v664_v42 = vadd.f32 %v1055_v23, %v663_v41 }
 0x3b3   :  { %v393_v43 = vstv %s392_s0  ;;  %v665_v44 = vrot.slane %v664_v42, 4  ;;  %v671_v45 = vmul.f32 %v664_v42, %v664_v42 }
 0x3b4   :  { %833 = vrsqrt.f32 %v393_v43 }
 0x3b5   :  { %v666_v46 = vadd.f32 %v665_v44, %v664_v42  ;;  %v672_v47 = vrot.slane %v671_v45, 4 }
 0x3b7   :  { %v667_v48 = vrot.slane %v666_v46, 2  ;;  %v673_v49 = vadd.f32 %v672_v47, %v671_v45 }
 0x3b9   :  { %v668_v50 = vadd.f32 %v667_v48, %v666_v46  ;;  %v674_v51 = vrot.slane %v673_v49, 2 }
 0x3bb   :  { %v669_v52 = vrot.slane %v668_v50, 1  ;;  %v675_v53 = vadd.f32 %v674_v51, %v673_v49 }
 0x3bd   :  { %v670_v54 = vadd.f32 %v669_v52, %v668_v50  ;;  %v676_v55 = vrot.slane %v675_v53, 1 }
 0x3be   :  { %v834_v56 = vpop.eup %833 }
 0x3bf   :  { %812 = vpush %v834_v56  ;;  %v678_v57 = vsel %vm364_vm3, %v670_v54, 0.0  ;;  %v677_v23 = vadd.f32 %v676_v55, %v675_v53 }
 0x3c0   :  { %679 = vadd.xlane.f32.xlu0 %v678_v57 }
 0x3c1   :  { %v689_v58 = vsel %vm364_vm3, %v677_v23, 0.0 }
 0x3c2   :  { %690 = vadd.xlane.f32.xlu1 %v689_v58 }
 0x3f0   :  { %s813_s24 = spop %812 }
 0x3f1   :  { %v396_v62 = vstv %s813_s24 }
 0x3f2   :  { %v397_v63 = vmul.f32 %v396_v62, %v391_v60 }
 0x3f4   :  { %v398_v4 = vmul.f32 %v397_v63, %v73_v61 }
 0x3f6   :  { %v399_v5 = vadd.f32 %v398_v4, %v74_v1 }
 0x3f8   :  { %400 = vst [vmem:[#allocation9] sm:$0xff] %v399_v5 }
 0x44d   :  { %v680_v6 = vpop.xlane.xlu0 %679 }
 0x44e   :  { %v681_v7 = vrot.slane %v680_v6, 4 }
 0x44f   :  { %v691_v8 = vpop.xlane.xlu1 %690 }
 0x450   :  { %v682_v0 = vadd.f32 %v681_v7, %v680_v6  ;;  %v692_v9 = vrot.slane %v691_v8, 4 }
 0x452   :  { %v683_v2 = vrot.slane %v682_v0, 2  ;;  %v693_v10 = vadd.f32 %v692_v9, %v691_v8 }
 0x454   :  { %v684_v11 = vadd.f32 %v683_v2, %v682_v0  ;;  %v694_v12 = vrot.slane %v693_v10, 2 }
 0x456   :  { %v695_v13 = vadd.f32 %v694_v12, %v693_v10  ;;  %v685_v14 = vrot.slane %v684_v11, 1 }
 0x458   :  { %v686_v15 = vadd.f32 %v685_v14, %v684_v11  ;;  %v696_v3 = vrot.slane %v695_v13, 1 }
 0x45a   :  { %814 = vpush %v686_v15  ;;  %v697_v16 = vadd.f32 %v696_v3, %v695_v13 }
 0x45c   :  { %816 = vpush %v697_v16 }
 0x48b   :  { %s815_s8 = spop %814 }
 0x48c   :  { %s688_s9 = smul.f32 0.0009765625, %s815_s8 }
 0x48d   :  { %s817_s29 = spop %816 }
 0x48e   :  { %s700_s5 = smul.f32 %s688_s9, %s688_s9  ;;  %v703_v19 = vstv %s688_s9 }
 0x48f   :  { %s699_s30 = smul.f32 0.0009765625, %s817_s29  ;;  %v704_v20 = vsub.f32 %v664_v42, %v703_v19 }
 0x491   :  { %s701_s11 = ssub.f32 %s699_s30, %s700_s5 }
 0x493   :  { %s702_s7 = smax.f32 %s920_s22, %s701_s11 }
 0x494   :  { %s705_s12 = sadd.f32 1e-05, %s702_s7 }
 0x496   :  { %v706_v17 = vstv %s705_s12 }
 0x497   :  { %835 = vrsqrt.f32 %v706_v17 }
 0x4a1   :  { %v836_v18 = vpop.eup %835 }
 0x4a2   :  { %818 = vpush %v836_v18 }
 0x4d3   :  { %s819_s13 = spop %818 }
 0x4d4   :  { %v709_v21 = vstv %s819_s13 }
 0x4d5   :  { %v710_v22 = vmul.f32 %v709_v21, %v704_v20 }
 0x4d7   :  { %v711_v24 = vmul.f32 %v710_v22, %v73_v61 }
 0x4d9   :  { %v712_v25 = vadd.f32 %v711_v24, %v74_v1 }
 0x4db   :  { %714 = vst [vmem:[#allocation9 + $0x8] sm:$0xff] %v712_v25 }
 0x4dc   :  { %892 = shalt.err (!%p889_p6)
}
 0x4dd   :  { %s893_s6 = scalar_lea.hbm %s1133_s10, 256 }
 0x4de   :  { %p894_p7 = scmp.ne.s32.totalorder %s1133_s10, %s893_s6  ;;  %p897_p8 = scmp.lt.u32.totalorder %s893_s6, %s1133_s10 }
 0x4e0   :  { %p899_p9 = pnand %p897_p8, %p894_p7 }
 0x4e2   :  { %902 = shalt.err (!%p899_p9)
}
 0x4e3   :  { %726 = dma.vmem_to_hbm [thread:$0]  %s721_s15, 256, %s1133_s10, [#allocation4], %s914_s1, %s914_s1, %s915_s17  }
 0x4e4   :  { %909 = dma.done.wait [#allocation4], 256  }
 0x4e5   :  { %910 = vsyncadd [#allocation4], 4294967040 }
 0x4e6   :  { %730 = vsyncpa [#allocation3], 1 }
 0x4e7   :  { %731 = vsyncpa [#allocation4], 1 }
 0x4e8   :  { %732 = vsyncpa [#allocation5], 1 }
 0x4e9   :  { %733 = vsyncpa [#allocation6], 1 }

</bundles_post_ra>
